<compile_context>
chip_gen: v6e
topology: v6e:2x2x1
jax: 0.10.0
libtpu: 0.0.40
codegen_flags: <defaults>
</compile_context>

<pallas_src>
import math

import numpy as np
import jax
import jax.numpy as jnp
from jax.experimental import pallas as pl
from jax.experimental.pallas import tpu as pltpu


# ----------------------------- LUT construction (init-time glue, plain numpy)
def build_int_lut(fn, r, addrwidth, bits):
    """Mirror IntLUT.__init__ exactly (power-of-two denom, int quantized table)."""
    alpha, beta = r
    entries = 2 ** addrwidth
    table_min = 0
    table_max = 2 ** bits - 1

    denom = (beta - alpha) / (entries - 1)
    log2denom = int(math.ceil(math.log2(denom)))
    denom = 2.0 ** log2denom

    indices = np.arange(entries, dtype=np.float32)
    x = indices * np.float32(denom) + np.float32(alpha)
    table = fn(x).astype(np.float32)

    # NOTE: like the reference, assumes fn's max over the grid is > 0.
    o_out = bits - int(math.ceil(math.log2(float(table.max()))))
    q = np.round(table * np.float32(2.0 ** o_out))
    q = np.clip(q, table_min, table_max).astype(np.int64)
    # Dequantized float32 table (what IntLUT.forward returns after / 2**O_out).
    tablef = (q.astype(np.float64) / (2.0 ** o_out)).astype(np.float32)

    return {
        "alpha": float(alpha),
        "denom": float(denom),
        "o_out": int(o_out),
        "entries": int(entries),
        "q": [int(v) for v in q],
        "tablef": [float(v) for v in tablef],
    }


def build_segmented_lut(fn, rs, addrwidth, bits):
    return [build_int_lut(fn, r, addrwidth, bits) for r in rs]


def pack_tables(lut_params, bits):
    """Pack the concatenated quantized integer tables into 32-bit words."""
    if bits <= 8:
        field_bits = 8
    elif bits <= 16:
        field_bits = 16
    else:
        field_bits = 32
    per_word = 32 // field_bits

    flat_q = []
    for p in lut_params:
        flat_q.extend(p["q"])
    while len(flat_q) % per_word:
        flat_q.append(0)

    words = []
    fmask = (1 << field_bits) - 1
    for base in range(0, len(flat_q), per_word):
        w = 0
        for j in range(per_word):
            w |= (int(flat_q[base + j]) & fmask) << (field_bits * j)
        if w >= (1 << 31):          # store as signed int32 immediate
            w -= (1 << 32)
        words.append(int(w))
    return {"field_bits": field_bits, "per_word": per_word, "words": words}


# ----------------------------------------------------------- Pallas kernel
def make_segmented_lut_kernel(lut_params, rs, packed):
    """Kernel closes over static per-segment constants + packed int table."""
    num_luts = len(rs)
    entries = lut_params[0]["entries"]

    field_bits = packed["field_bits"]
    per_word = packed["per_word"]
    words = packed["words"]
    n_words = len(words)
    word_shift = int(math.log2(per_word))              # per_word in {1, 2, 4}
    fb_log2 = int(math.log2(field_bits))               # 3 / 4 / 5
    field_mask = np.int32((1 << field_bits) - 1) if field_bits < 32 else None

    inv_denoms = [np.float32(1.0 / p["denom"]) for p in lut_params]       # exact 2^k
    biases = [np.float32(-p["alpha"]) * np.float32(1.0 / p["denom"])      # exact
              for p in lut_params]
    scales = [np.float32(2.0 ** (-p["o_out"])) for p in lut_params]       # exact
    bases = [np.float32(i * entries) for i in range(num_luts)]            # exact ints

    # Trace-time: sorted + contiguous ranges  =>  every real number is covered
    # and the reference's last-match-wins segment is simply the largest i with
    # x >= alpha_i.  (Holds for the reference builder's range lists.)
    contiguous = num_luts >= 2 and all(
        rs[i][0] >= rs[i - 1][0] and rs[i][0] <= rs[i - 1][1]
        for i in range(1, num_luts))

    def lookup(x, inv_denom, bias, scale, basef, keep):
        # LUT index; denom is an exact power of two and bias = -alpha/denom is
        # exact, so floor(x*inv + bias) is bit-identical to the reference's
        # floor((x - alpha)/denom).
        idxf = jnp.floor(x * inv_denom + bias)
        idxf = jnp.clip(idxf, 0.0, np.float32(entries - 1))
        gidx = (idxf + basef).astype(jnp.int32)          # flat table index

        # --- packed-word "gather": balanced mux tree keyed on word-index bits
        if n_words == 1:
            word = jnp.full(x.shape, np.int32(words[0]), dtype=jnp.int32)
        else:
            nbits = (n_words - 1).bit_length()
            bit = [(gidx & np.int32(1 << (k + word_shift))) != 0
                   for k in range(nbits)]

            def build(base, level):
                if base >= n_words:
                    return None
                if level == 0:
                    return jnp.full(x.shape, np.int32(words[base]),
                                    dtype=jnp.int32)
                lo = build(base, level - 1)
                hi = build(base + (1 << (level - 1)), level - 1)
                if hi is None:
                    return lo
                return jnp.where(bit[level - 1], hi, lo)

            word = build(0, nbits)

        # --- unpack the selected 8/16-bit field and dequantize
        if per_word > 1:
            shift = (gidx & np.int32(per_word - 1)) << fb_log2
            q = jax.lax.shift_right_logical(word, shift)
        else:
            q = word
        if field_mask is not None:
            q = q & field_mask
        val = q.astype(jnp.float32) * scale              # dequant: q * 2^-O_out
        return jnp.where(keep, val, np.float32(0.0))

    if contiguous:
        def kernel(x_ref, o_ref):
            x = x_ref[...]                               # (BR, 128) float32
            # shared boundary predicates (K-1 compares)
            ge = [x >= np.float32(rs[i][0]) for i in range(1, num_luts)]

            def sel(vals):                               # last-match-wins fold
                out = jnp.full(x.shape, vals[0], dtype=jnp.float32)
                for i in range(1, num_luts):
                    out = jnp.where(ge[i - 1], vals[i], out)
                return out

            inv_denom = sel(inv_denoms)
            bias = sel(biases)
            scale = sel(scales)
            basef = sel(bases)
            # ranges cover all reals; only NaN fails every reference mask
            o_ref[...] = lookup(x, inv_denom, bias, scale, basef, x == x)
    else:
        def kernel(x_ref, o_ref):                        # general masked path
            x = x_ref[...]
            masks = []
            for i in range(num_luts):
                lo, hi = rs[i]
                if i == 0:
                    m = x <= np.float32(hi)
                elif i == num_luts - 1:
                    m = x >= np.float32(lo)
                else:
                    m = (x >= np.float32(lo)) & (x <= np.float32(hi))
                masks.append(m)

            covered = masks[0]
            for m in masks[1:]:
                covered = covered | m

            def sel(vals):                               # last-match-wins fold
                out = jnp.full(x.shape, vals[0], dtype=jnp.float32)
                for i in range(1, num_luts):
                    out = jnp.where(masks[i], vals[i], out)
                return out

            inv_denom = sel(inv_denoms)
            bias = sel(biases)
            scale = sel(scales)
            basef = sel(bases)
            o_ref[...] = lookup(x, inv_denom, bias, scale, basef, covered)

    return kernel


def int_segmented_lut_forward(t, lut_params, rs, packed, block_rows=2048):
    """Wrapper: view as (rows, 128), run the Pallas kernel, view back."""
    lane = 128
    orig_shape = t.shape
    x = jnp.asarray(t, dtype=jnp.float32)
    n = int(x.size)
    if n == 0:
        return jnp.zeros(orig_shape, dtype=jnp.float32)

    cdiv = lambda a, b: -(-a // b)
    rows = cdiv(n, lane)
    rows8 = cdiv(rows, 8) * 8

    # Block rows: large to amortize the ~0.35us/step grid overhead, multiple
    # of 8 for (8,128) tiling, but capped so the grid keeps >= 2 steps where
    # possible (v7x megacore sharding across its two TensorCores).
    half = cdiv(cdiv(rows, 2), 8) * 8
    br_cap = max(8, min(cdiv(block_rows, 8) * 8, max(8, half), rows8))

    # Prefer a block size that exactly tiles the row count so the wrapper
    # never has to materialize a padded copy of the input.
    br = br_cap
    if rows8 % br_cap != 0:
        cand = br_cap - 8
        while cand >= max(8, br_cap // 2):
            if rows8 % cand == 0:
                br = cand
                break
            cand -= 8

    m = cdiv(rows, br) * br
    pad = m * lane - n

    flat = x.reshape(-1)
    if pad:
        flat = jnp.pad(flat, (0, pad))       # only for ragged inputs
    x2 = flat.reshape(m, lane)               # metadata-only when pad == 0

    kernel = make_segmented_lut_kernel(lut_params, rs, packed)
    out2 = pl.pallas_call(
        kernel,
        out_shape=jax.ShapeDtypeStruct((m, lane), jnp.float32),
        grid=(m // br,),
        in_specs=[pl.BlockSpec((br, lane), lambda i: (i, 0))],
        out_specs=pl.BlockSpec((br, lane), lambda i: (i, 0)),
        compiler_params=pltpu.CompilerParams(
            dimension_semantics=("parallel",),
            vmem_limit_bytes=48 * 1024 * 1024,
        ),
    )(x2)

    out = out2.reshape(-1)
    if pad:
        out = out[:n]
    return out.reshape(orig_shape)


# --------------------------------------------------- pure-JAX reference check
def int_segmented_lut_reference(t, lut_params, rs):
    t = t.astype(jnp.float32)
    out = jnp.zeros_like(t)
    for i, r in enumerate(rs):
        p = lut_params[i]
        entries = p["entries"]
        idx = jnp.floor((t - p["alpha"]) / p["denom"]).astype(jnp.int32)
        idx = jnp.clip(idx, 0, entries - 1)
        table = jnp.asarray(p["tablef"], dtype=jnp.float32)
        gathered = table[idx]
        if i == 0:
            mask = t <= r[1]
        elif i == len(rs) - 1:
            mask = t >= r[0]
        else:
            mask = (t >= r[0]) & (t <= r[1])
        out = jnp.where(mask, gathered, out)
    return out


if __name__ == "__main__":
    # Module config (synthetic, deterministic): exp LUT split in 3 segments,
    # 6-bit address width (64 entries per segment), 8-bit table values.
    rs = [(-10.0, -5.0), (-5.0, -2.5), (-2.5, 0.0)]
    addrwidth = 6
    bits = 8
    lut_params = build_segmented_lut(np.exp, rs, addrwidth, bits)
    packed = pack_tables(lut_params, bits)

    # Small NCHW-like input, deterministic.
    key = jax.random.PRNGKey(0)
    t = jax.random.normal(key, (2, 4, 16, 16), dtype=jnp.float32) * 3.0 - 3.0

    out = int_segmented_lut_forward(t, lut_params, rs, packed)
    out = jax.block_until_ready(out)

    ref = jax.block_until_ready(int_segmented_lut_reference(t, lut_params, rs))
    assert out.shape == t.shape and out.dtype == jnp.float32
    np.testing.assert_allclose(np.asarray(out), np.asarray(ref), rtol=0, atol=1e-6)

    print("KERNEL_OK")
</pallas_src>

<mosaic_0001>
module attributes {stable_mosaic.version = 11 : i64} {
  func.func @kernel(%arg0: i32, %arg1: memref<8x128xf32, #tpu.memory_space<vmem>>, %arg2: memref<8x128xf32, #tpu.memory_space<vmem>>) attributes {dimension_semantics = [#tpu.dimension_semantics<parallel>], iteration_bounds = array<i64: 2>, scalar_prefetch = 0 : i64, scratch_operands = 0 : i64, tpu.core_type = #tpu.core_type<tc>, window_params = [{transform_indices = @transform_0, window_bounds = array<i64: 8, 128>}, {transform_indices = @transform_1, window_bounds = array<i64: 8, 128>}]} {
    %c0 = arith.constant 0 : index
    %c0_0 = arith.constant 0 : index
    %0 = vector.load %arg1[%c0, %c0_0] : memref<8x128xf32, #tpu.memory_space<vmem>>, vector<8x128xf32>
    %cst = arith.constant -5.000000e+00 : f32
    %1 = vector.broadcast %cst : f32 to vector<8x128xf32>
    %2 = arith.cmpf oge, %0, %1 : vector<8x128xf32>
    %cst_1 = arith.constant -2.500000e+00 : f32
    %3 = vector.broadcast %cst_1 : f32 to vector<8x128xf32>
    %4 = arith.cmpf oge, %0, %3 : vector<8x128xf32>
    %cst_2 = arith.constant 8.000000e+00 : f32
    %5 = vector.broadcast %cst_2 : f32 to vector<8x128xf32>
    %cst_3 = arith.constant 1.600000e+01 : f32
    %6 = vector.broadcast %cst_3 : f32 to vector<8x128xf32>
    %7 = arith.select %2, %6, %5 : vector<8x128xi1>, vector<8x128xf32>
    %cst_4 = arith.constant 1.600000e+01 : f32
    %8 = vector.broadcast %cst_4 : f32 to vector<8x128xf32>
    %9 = arith.select %4, %8, %7 : vector<8x128xi1>, vector<8x128xf32>
    %cst_5 = arith.constant 8.000000e+01 : f32
    %10 = vector.broadcast %cst_5 : f32 to vector<8x128xf32>
    %cst_6 = arith.constant 8.000000e+01 : f32
    %11 = vector.broadcast %cst_6 : f32 to vector<8x128xf32>
    %12 = arith.select %2, %11, %10 : vector<8x128xi1>, vector<8x128xf32>
    %cst_7 = arith.constant 4.000000e+01 : f32
    %13 = vector.broadcast %cst_7 : f32 to vector<8x128xf32>
    %14 = arith.select %4, %13, %12 : vector<8x128xi1>, vector<8x128xf32>
    %cst_8 = arith.constant 4.8828125E-4 : f32
    %15 = vector.broadcast %cst_8 : f32 to vector<8x128xf32>
    %cst_9 = arith.constant 0.001953125 : f32
    %16 = vector.broadcast %cst_9 : f32 to vector<8x128xf32>
    %17 = arith.select %2, %16, %15 : vector<8x128xi1>, vector<8x128xf32>
    %cst_10 = arith.constant 3.125000e-02 : f32
    %18 = vector.broadcast %cst_10 : f32 to vector<8x128xf32>
    %19 = arith.select %4, %18, %17 : vector<8x128xi1>, vector<8x128xf32>
    %cst_11 = arith.constant 0.000000e+00 : f32
    %20 = vector.broadcast %cst_11 : f32 to vector<8x128xf32>
    %cst_12 = arith.constant 6.400000e+01 : f32
    %21 = vector.broadcast %cst_12 : f32 to vector<8x128xf32>
    %22 = arith.select %2, %21, %20 : vector<8x128xi1>, vector<8x128xf32>
    %cst_13 = arith.constant 1.280000e+02 : f32
    %23 = vector.broadcast %cst_13 : f32 to vector<8x128xf32>
    %24 = arith.select %4, %23, %22 : vector<8x128xi1>, vector<8x128xf32>
    %25 = arith.cmpf oeq, %0, %0 : vector<8x128xf32>
    %26 = arith.mulf %0, %9 : vector<8x128xf32>
    %27 = arith.addf %26, %14 : vector<8x128xf32>
    %28 = math.floor %27 : vector<8x128xf32>
    %cst_14 = arith.constant 0.000000e+00 : f32
    %cst_15 = arith.constant 6.300000e+01 : f32
    %29 = vector.broadcast %cst_14 : f32 to vector<8x128xf32>
    %30 = arith.maximumf %29, %28 : vector<8x128xf32>
    %31 = vector.broadcast %cst_15 : f32 to vector<8x128xf32>
    %32 = arith.minimumf %31, %30 : vector<8x128xf32>
    %33 = arith.addf %32, %24 : vector<8x128xf32>
    %34 = arith.fptosi %33 : vector<8x128xf32> to vector<8x128xi32>
    %c4_i32 = arith.constant 4 : i32
    %35 = vector.broadcast %c4_i32 : i32 to vector<8x128xi32>
    %36 = arith.andi %34, %35 : vector<8x128xi32>
    %c0_i32 = arith.constant 0 : i32
    %37 = vector.broadcast %c0_i32 : i32 to vector<8x128xi32>
    %38 = arith.cmpi ne, %36, %37 : vector<8x128xi32>
    %c8_i32 = arith.constant 8 : i32
    %39 = vector.broadcast %c8_i32 : i32 to vector<8x128xi32>
    %40 = arith.andi %34, %39 : vector<8x128xi32>
    %c0_i32_16 = arith.constant 0 : i32
    %41 = vector.broadcast %c0_i32_16 : i32 to vector<8x128xi32>
    %42 = arith.cmpi ne, %40, %41 : vector<8x128xi32>
    %c16_i32 = arith.constant 16 : i32
    %43 = vector.broadcast %c16_i32 : i32 to vector<8x128xi32>
    %44 = arith.andi %34, %43 : vector<8x128xi32>
    %c0_i32_17 = arith.constant 0 : i32
    %45 = vector.broadcast %c0_i32_17 : i32 to vector<8x128xi32>
    %46 = arith.cmpi ne, %44, %45 : vector<8x128xi32>
    %c32_i32 = arith.constant 32 : i32
    %47 = vector.broadcast %c32_i32 : i32 to vector<8x128xi32>
    %48 = arith.andi %34, %47 : vector<8x128xi32>
    %c0_i32_18 = arith.constant 0 : i32
    %49 = vector.broadcast %c0_i32_18 : i32 to vector<8x128xi32>
    %50 = arith.cmpi ne, %48, %49 : vector<8x128xi32>
    %c64_i32 = arith.constant 64 : i32
    %51 = vector.broadcast %c64_i32 : i32 to vector<8x128xi32>
    %52 = arith.andi %34, %51 : vector<8x128xi32>
    %c0_i32_19 = arith.constant 0 : i32
    %53 = vector.broadcast %c0_i32_19 : i32 to vector<8x128xi32>
    %54 = arith.cmpi ne, %52, %53 : vector<8x128xi32>
    %c128_i32 = arith.constant 128 : i32
    %55 = vector.broadcast %c128_i32 : i32 to vector<8x128xi32>
    %56 = arith.andi %34, %55 : vector<8x128xi32>
    %c0_i32_20 = arith.constant 0 : i32
    %57 = vector.broadcast %c0_i32_20 : i32 to vector<8x128xi32>
    %58 = arith.cmpi ne, %56, %57 : vector<8x128xi32>
    %c0_i32_21 = arith.constant 0 : i32
    %59 = vector.broadcast %c0_i32_21 : i32 to vector<8x128xi32>
    %c0_i32_22 = arith.constant 0 : i32
    %60 = vector.broadcast %c0_i32_22 : i32 to vector<8x128xi32>
    %61 = arith.select %38, %60, %59 : vector<8x128xi1>, vector<8x128xi32>
    %c0_i32_23 = arith.constant 0 : i32
    %62 = vector.broadcast %c0_i32_23 : i32 to vector<8x128xi32>
    %c16842752_i32 = arith.constant 16842752 : i32
    %63 = vector.broadcast %c16842752_i32 : i32 to vector<8x128xi32>
    %64 = arith.select %38, %63, %62 : vector<8x128xi1>, vector<8x128xi32>
    %65 = arith.select %42, %64, %61 : vector<8x128xi1>, vector<8x128xi32>
    %c16843009_i32 = arith.constant 16843009 : i32
    %66 = vector.broadcast %c16843009_i32 : i32 to vector<8x128xi32>
    %c33620225_i32 = arith.constant 33620225 : i32
    %67 = vector.broadcast %c33620225_i32 : i32 to vector<8x128xi32>
    %68 = arith.select %38, %67, %66 : vector<8x128xi1>, vector<8x128xi32>
    %c50463234_i32 = arith.constant 50463234 : i32
    %69 = vector.broadcast %c50463234_i32 : i32 to vector<8x128xi32>
    %c67371779_i32 = arith.constant 67371779 : i32
    %70 = vector.broadcast %c67371779_i32 : i32 to vector<8x128xi32>
    %71 = arith.select %38, %70, %69 : vector<8x128xi1>, vector<8x128xi32>
    %72 = arith.select %42, %71, %68 : vector<8x128xi1>, vector<8x128xi32>
    %73 = arith.select %46, %72, %65 : vector<8x128xi1>, vector<8x128xi32>
    %c117900805_i32 = arith.constant 117900805 : i32
    %74 = vector.broadcast %c117900805_i32 : i32 to vector<8x128xi32>
    %c202049800_i32 = arith.constant 202049800 : i32
    %75 = vector.broadcast %c202049800_i32 : i32 to vector<8x128xi32>
    %76 = arith.select %38, %75, %74 : vector<8x128xi1>, vector<8x128xi32>
    %c336728078_i32 = arith.constant 336728078 : i32
    %77 = vector.broadcast %c336728078_i32 : i32 to vector<8x128xi32>
    %c555555351_i32 = arith.constant 555555351 : i32
    %78 = vector.broadcast %c555555351_i32 : i32 to vector<8x128xi32>
    %79 = arith.select %38, %78, %77 : vector<8x128xi1>, vector<8x128xi32>
    %80 = arith.select %42, %79, %76 : vector<8x128xi1>, vector<8x128xi32>
    %c925903654_i32 = arith.constant 925903654 : i32
    %81 = vector.broadcast %c925903654_i32 : i32 to vector<8x128xi32>
    %c1515144766_i32 = arith.constant 1515144766 : i32
    %82 = vector.broadcast %c1515144766_i32 : i32 to vector<8x128xi32>
    %83 = arith.select %38, %82, %81 : vector<8x128xi1>, vector<8x128xi32>
    %c-1803324314_i32 = arith.constant -1803324314 : i32
    %84 = vector.broadcast %c-1803324314_i32 : i32 to vector<8x128xi32>
    %c-170344792_i32 = arith.constant -170344792 : i32
    %85 = vector.broadcast %c-170344792_i32 : i32 to vector<8x128xi32>
    %86 = arith.select %38, %85, %84 : vector<8x128xi1>, vector<8x128xi32>
    %87 = arith.select %42, %86, %83 : vector<8x128xi1>, vector<8x128xi32>
    %88 = arith.select %46, %87, %80 : vector<8x128xi1>, vector<8x128xi32>
    %89 = arith.select %50, %88, %73 : vector<8x128xi1>, vector<8x128xi32>
    %c67372035_i32 = arith.constant 67372035 : i32
    %90 = vector.broadcast %c67372035_i32 : i32 to vector<8x128xi32>
    %c84215044_i32 = arith.constant 84215044 : i32
    %91 = vector.broadcast %c84215044_i32 : i32 to vector<8x128xi32>
    %92 = arith.select %38, %91, %90 : vector<8x128xi1>, vector<8x128xi32>
    %c117835270_i32 = arith.constant 117835270 : i32
    %93 = vector.broadcast %c117835270_i32 : i32 to vector<8x128xi32>
    %c151521287_i32 = arith.constant 151521287 : i32
    %94 = vector.broadcast %c151521287_i32 : i32 to vector<8x128xi32>
    %95 = arith.select %38, %94, %93 : vector<8x128xi1>, vector<8x128xi32>
    %96 = arith.select %42, %95, %92 : vector<8x128xi1>, vector<8x128xi32>
    %c185272841_i32 = arith.constant 185272841 : i32
    %97 = vector.broadcast %c185272841_i32 : i32 to vector<8x128xi32>
    %c252579084_i32 = arith.constant 252579084 : i32
    %98 = vector.broadcast %c252579084_i32 : i32 to vector<8x128xi32>
    %99 = arith.select %38, %98, %97 : vector<8x128xi1>, vector<8x128xi32>
    %c319950863_i32 = arith.constant 319950863 : i32
    %100 = vector.broadcast %c319950863_i32 : i32 to vector<8x128xi32>
    %c404100372_i32 = arith.constant 404100372 : i32
    %101 = vector.broadcast %c404100372_i32 : i32 to vector<8x128xi32>
    %102 = arith.select %38, %101, %100 : vector<8x128xi1>, vector<8x128xi32>
    %103 = arith.select %42, %102, %99 : vector<8x128xi1>, vector<8x128xi32>
    %104 = arith.select %46, %103, %96 : vector<8x128xi1>, vector<8x128xi32>
    %c522001177_i32 = arith.constant 522001177 : i32
    %105 = vector.broadcast %c522001177_i32 : i32 to vector<8x128xi32>
    %c656745249_i32 = arith.constant 656745249 : i32
    %106 = vector.broadcast %c656745249_i32 : i32 to vector<8x128xi32>
    %107 = arith.select %38, %106, %105 : vector<8x128xi1>, vector<8x128xi32>
    %c858795306_i32 = arith.constant 858795306 : i32
    %108 = vector.broadcast %c858795306_i32 : i32 to vector<8x128xi32>
    %c1094531382_i32 = arith.constant 1094531382 : i32
    %109 = vector.broadcast %c1094531382_i32 : i32 to vector<8x128xi32>
    %110 = arith.select %38, %109, %108 : vector<8x128xi1>, vector<8x128xi32>
    %111 = arith.select %42, %110, %107 : vector<8x128xi1>, vector<8x128xi32>
    %c1414482501_i32 = arith.constant 1414482501 : i32
    %112 = vector.broadcast %c1414482501_i32 : i32 to vector<8x128xi32>
    %c1801805657_i32 = arith.constant 1801805657 : i32
    %113 = vector.broadcast %c1801805657_i32 : i32 to vector<8x128xi32>
    %114 = arith.select %38, %113, %112 : vector<8x128xi1>, vector<8x128xi32>
    %c-1971225998_i32 = arith.constant -1971225998 : i32
    %115 = vector.broadcast %c-1971225998_i32 : i32 to vector<8x128xi32>
    %c-1314481005_i32 = arith.constant -1314481005 : i32
    %116 = vector.broadcast %c-1314481005_i32 : i32 to vector<8x128xi32>
    %117 = arith.select %38, %116, %115 : vector<8x128xi1>, vector<8x128xi32>
    %118 = arith.select %42, %117, %114 : vector<8x128xi1>, vector<8x128xi32>
    %119 = arith.select %46, %118, %111 : vector<8x128xi1>, vector<8x128xi32>
    %120 = arith.select %50, %119, %104 : vector<8x128xi1>, vector<8x128xi32>
    %121 = arith.select %54, %120, %89 : vector<8x128xi1>, vector<8x128xi32>
    %c50529027_i32 = arith.constant 50529027 : i32
    %122 = vector.broadcast %c50529027_i32 : i32 to vector<8x128xi32>
    %c67372035_i32_24 = arith.constant 67372035 : i32
    %123 = vector.broadcast %c67372035_i32_24 : i32 to vector<8x128xi32>
    %124 = arith.select %38, %123, %122 : vector<8x128xi1>, vector<8x128xi32>
    %c84215044_i32_25 = arith.constant 84215044 : i32
    %125 = vector.broadcast %c84215044_i32_25 : i32 to vector<8x128xi32>
    %c117835270_i32_26 = arith.constant 117835270 : i32
    %126 = vector.broadcast %c117835270_i32_26 : i32 to vector<8x128xi32>
    %127 = arith.select %38, %126, %125 : vector<8x128xi1>, vector<8x128xi32>
    %128 = arith.select %42, %127, %124 : vector<8x128xi1>, vector<8x128xi32>
    %c151521287_i32_27 = arith.constant 151521287 : i32
    %129 = vector.broadcast %c151521287_i32_27 : i32 to vector<8x128xi32>
    %c185207305_i32 = arith.constant 185207305 : i32
    %130 = vector.broadcast %c185207305_i32 : i32 to vector<8x128xi32>
    %131 = arith.select %38, %130, %129 : vector<8x128xi1>, vector<8x128xi32>
    %c235736332_i32 = arith.constant 235736332 : i32
    %132 = vector.broadcast %c235736332_i32 : i32 to vector<8x128xi32>
    %c303108111_i32 = arith.constant 303108111 : i32
    %133 = vector.broadcast %c303108111_i32 : i32 to vector<8x128xi32>
    %134 = arith.select %38, %133, %132 : vector<8x128xi1>, vector<8x128xi32>
    %135 = arith.select %42, %134, %131 : vector<8x128xi1>, vector<8x128xi32>
    %136 = arith.select %46, %135, %128 : vector<8x128xi1>, vector<8x128xi32>
    %c387323155_i32 = arith.constant 387323155 : i32
    %137 = vector.broadcast %c387323155_i32 : i32 to vector<8x128xi32>
    %c505158425_i32 = arith.constant 505158425 : i32
    %138 = vector.broadcast %c505158425_i32 : i32 to vector<8x128xi32>
    %139 = arith.select %38, %138, %137 : vector<8x128xi1>, vector<8x128xi32>
    %c656679456_i32 = arith.constant 656679456 : i32
    %140 = vector.broadcast %c656679456_i32 : i32 to vector<8x128xi32>
    %c841952297_i32 = arith.constant 841952297 : i32
    %141 = vector.broadcast %c841952297_i32 : i32 to vector<8x128xi32>
    %142 = arith.select %38, %141, %140 : vector<8x128xi1>, vector<8x128xi32>
    %143 = arith.select %42, %142, %139 : vector<8x128xi1>, vector<8x128xi32>
    %c1077688373_i32 = arith.constant 1077688373 : i32
    %144 = vector.broadcast %c1077688373_i32 : i32 to vector<8x128xi32>
    %c1380796484_i32 = arith.constant 1380796484 : i32
    %145 = vector.broadcast %c1380796484_i32 : i32 to vector<8x128xi32>
    %146 = arith.select %38, %145, %144 : vector<8x128xi1>, vector<8x128xi32>
    %c1768119639_i32 = arith.constant 1768119639 : i32
    %147 = vector.broadcast %c1768119639_i32 : i32 to vector<8x128xi32>
    %c-2021689488_i32 = arith.constant -2021689488 : i32
    %148 = vector.broadcast %c-2021689488_i32 : i32 to vector<8x128xi32>
    %149 = arith.select %38, %148, %147 : vector<8x128xi1>, vector<8x128xi32>
    %150 = arith.select %42, %149, %146 : vector<8x128xi1>, vector<8x128xi32>
    %151 = arith.select %46, %150, %143 : vector<8x128xi1>, vector<8x128xi32>
    %152 = arith.select %50, %151, %136 : vector<8x128xi1>, vector<8x128xi32>
    %153 = arith.select %58, %152, %121 : vector<8x128xi1>, vector<8x128xi32>
    %c3_i32 = arith.constant 3 : i32
    %154 = vector.broadcast %c3_i32 : i32 to vector<8x128xi32>
    %155 = arith.andi %34, %154 : vector<8x128xi32>
    %c3_i32_28 = arith.constant 3 : i32
    %156 = vector.broadcast %c3_i32_28 : i32 to vector<8x128xi32>
    %157 = arith.shli %155, %156 : vector<8x128xi32>
    %158 = arith.shrui %153, %157 : vector<8x128xi32>
    %c255_i32 = arith.constant 255 : i32
    %159 = vector.broadcast %c255_i32 : i32 to vector<8x128xi32>
    %160 = arith.andi %158, %159 : vector<8x128xi32>
    %161 = arith.sitofp %160 : vector<8x128xi32> to vector<8x128xf32>
    %162 = arith.mulf %161, %19 : vector<8x128xf32>
    %cst_29 = arith.constant 0.000000e+00 : f32
    %163 = vector.broadcast %cst_29 : f32 to vector<8x128xf32>
    %164 = arith.select %25, %162, %163 : vector<8x128xi1>, vector<8x128xf32>
    %c0_30 = arith.constant 0 : index
    %c0_31 = arith.constant 0 : index
    %165 = vector.load %arg2[%c0_30, %c0_31] : memref<8x128xf32, #tpu.memory_space<vmem>>, vector<8x128xf32>
    tpu.vector_store %arg2[%c0_30, %c0_31], %164 {strides = array<i32>} : memref<8x128xf32, #tpu.memory_space<vmem>>, vector<8x128xf32>,
    return
  }
  func.func @transform_0(%arg0: i32) -> (i32, i32) {
    %c0_i32 = arith.constant 0 : i32
    %c0_i32_0 = arith.constant 0 : i32
    return %arg0, %c0_i32 : i32, i32
  }
  func.func @transform_1(%arg0: i32) -> (i32, i32) {
    %c0_i32 = arith.constant 0 : i32
    %c0_i32_0 = arith.constant 0 : i32
    return %arg0, %c0_i32 : i32, i32
  }
}

</mosaic_0001>

<bundles_post_ra>
// kernel: tpu_custom_call.1
= control target key start
LH: loop header
LB: loop body
LE: loop exit
PB: predicated region body
PF: predicated region fallthrough
CT: control target
= control target key end

     0   :  { %6 = vsyncpa [#allocation3], 0  ;;  %s815_s0 = inlined_call_operand.hbm [shape: f32[16,128], index: 0, kind: input, shape index: {}]   ;;  %s816_s1 = inlined_call_operand.hbm [shape: f32[16,128], index: 1, kind: output, shape index: {}]  }
   0x1   :  { %8 = vsyncpa [#allocation3 + $0x1], 0 }
   0x2   :  { %9 = vsyncpa [#allocation4], 0 }
   0x3   :  { %11 = vsyncpa [#allocation4 + $0x1], 0  ;;  %s520_s6 = smov 0   ;;  %s522_s7 = smov 0  }
   0x4   :  { %s524_s8 = smov 0   ;;  %s526_s9 = smov 0  }
   0x5 LB: > { %s541_s10 = sadd.s32 4294967295, %s479_s9   ;;  %s300_s11 = sadd.s32 4294967294, %s479_s9   ;;  %s479_s9 = sphi %s526_s9, %s843_s9   ;;  %s475_s8 = sphi %s524_s8, %s842_s8   ;;  %s471_s7 = sphi %s522_s7, %s841_s7   ;;  %s467_s6 = sphi %s520_s6, %s840_s6  }
   0x6   : > { %s545_s12 = sadd.s32 1, %s479_s9   ;;  %s24_s13 = sadd.s32 1, %s475_s8 }
   0x7   : > { %s21_s14 = ssub.s32 %s479_s9, %s545_s12  ;;  %p31_p0 = scmp.ne.s32.totalorder %s475_s8, %s471_s7 }
   0x8   : > { %p22_p1 = scmp.eq.s32.totalorder %s21_s14, 0  ;;  %p32_p2 = scmp.eq.s32.totalorder %s479_s9, 0 }
   0x9   : > { %p37_p3 = scmp.ne.s32.totalorder %s471_s7, %s467_s6  ;;  %p38_p4 = scmp.eq.s32.totalorder %s541_s10, 0 }
   0xa   : > { %s557_s15 = scalar_select %p22_p1, %s475_s8, %s24_s13  }
   0xb   : > { %p559_p5 = por %p32_p2, %p31_p0  ;;  %p563_p6 = por %p38_p4, %p37_p3 }
   0xc   : > { %p61_p7 = scmp.eq.s32.totalorder %s541_s10, 1  ;;  %p67_p8 = scmp.eq.s32.totalorder %s300_s11, 1 }
   0xd   : > { %s820_s17 = scalar_select %p563_p6, 1, 0 }
   0xe   : > { %p326_p10 = scmp.lt.s32.totalorder %s479_s9, 2  ;;  %p570_p11 = por %p61_p7, %p31_p0 }
   0xf   : > { %p574_p12 = por %p67_p8, %p37_p3  ;;  %s87_s20 = sand.u32 1, %s475_s8  }
  0x10   : > { %s821_s18 = scalar_select %p570_p11, 1, 0 }
  0x11   : > { %s822_s19 = scalar_select %p574_p12, 1, 0 }
  0x12   : > { %s304_s21 = sshll.u32 %s479_s9, 7  ;;  %s303_s22 = sshll.u32 %s87_s20, 3 }
  0x13   : > { %s583_s25 = scalar_lea.hbm %s815_s0, %s304_s21  ;;  %s91_s26 = scalar_lea.vmem [#allocation2], %s303_s22 }
  0x14   : > { %s98_s27 = sshll.u32 %s91_s26, 4  ;;  %p587_p13 = pnand %p326_p10, %p559_p5  ;;  %s591_s27 = int_to_ptr.vmem [resolvable:$true] %s98_s27 }
  0x15   : > { %s88_s29 = scalar_lea.sflag [#allocation3], %s87_s20  ;;  %s387_s30 = scalar_lea.hbm %s583_s25, 128 }
  0x16   : > { %p388_p2 = scmp.ne.s32.totalorder %s583_s25, %s387_s30  ;;  %p389_p3 = pneg %p587_p13 }
  0x17   : > { %s392_s4 = scalar_lea.hbm %s815_s0, 256  ;;  %p393_p5 = scmp.lt.s32.totalorder %s583_s25, %s815_s0 }
  0x18   : > { %p390_p4 = pnand %p389_p3, %p388_p2  ;;  %p394_p8 = scmp.lt.s32.totalorder %s392_s4, %s387_s30 }
  0x1a   : > { %p391_p7 = pneg %p390_p4  ;;  %p395_p10 = por %p394_p8, %p393_p5 }
  0x1c   : > { %p396_p9 = pnand %p395_p10, %p391_p7 }
  0x1e   : > { %399 = shalt.err (!%p396_p9)
}
  0x1f   : > { %s400_s13 = scalar_lea.vmem %s591_s27, 128  ;;  %s481_s14 = smov [#allocation2]  }
  0x20   : > { %p401_p0 = scmp.ne.s32.totalorder %s591_s27, %s400_s13  ;;  %s405_s16 = sshll.u32 %s481_s14, 4  ;;  %s406_s16 = int_to_ptr.vmem [resolvable:$false] %s405_s16 }
  0x21   : > { %s407_s20 = scalar_lea.vmem %s406_s16, 256  ;;  %p408_p4 = scmp.lt.s32.totalorder %s591_s27, %s406_s16 }
  0x22   : > { %p403_p1 = pnand %p401_p0, %p389_p3  ;;  %p409_p12 = scmp.lt.s32.totalorder %s407_s20, %s400_s13 }
  0x24   : > { %p404_p2 = pneg %p403_p1  ;;  %p410_p11 = por %p409_p12, %p408_p4 }
  0x26   : > { %p411_p6 = pnand %p410_p11, %p404_p2 }
  0x28   : > { %414 = shalt.err (!%p411_p6)
}
  0x29   : > { %321 = dma.hbm_to_vmem [thread:$0]  (!%p587_p13), %s583_s25, 128, %s591_s27, %s88_s29  }
  0x2a   : > { %p824_p9 = scmp.lt.s32.totalorder %s479_s9, 3  ;;  %p825_p7 = scmp.ge.s32.totalorder %s479_s9, 1 }
  0x2c   : > { %p104_p0 = pnand %p825_p7, %p824_p9 }
  0x2d   : > { %s618_s21 = sand.u32 (!%p104_p0), 1, %s471_s7   ;;  %p826_p6 = scmp.ne.s32.totalorder (!%p104_p0), %s820_s17, 0 }
  0x2e   : > { %107 = sbr.rel (%p104_p0) target bundleno = 113 (0x71), region = 24  ;;  %s306_s22 = sshll.u32 (!%p104_p0), %s618_s21, 3 }
  0x2f   : > { %s110_s23 = scalar_lea.sflag (!%p104_p0), [#allocation3], %s618_s21  ;;  %s113_s24 = scalar_lea.vmem (!%p104_p0), [#allocation2], %s306_s22 }
  0x33   : > { %458 = dma.done.wait (%p826_p6), %s110_s23, 128  }
  0x34   : > { %460 = vsyncadd (%p826_p6), %s110_s23, 4294967168  ;;  %v628_v0 = vld [vmem:[%s113_s24] sm:$0xff]  ;;  %v482_v1 = vmov 8.0   ;;  %v483_v4 = vmov 80.0   ;;  %v484_v8 = vmov 0.0   ;;  %v485_v28 = vmov 0  }
  0x35   : > { %vm133_vm0 = vcmp.ge.f32.partialorder %v628_v0, -5.0  ;;  %vm134_vm1 = vcmp.ge.f32.partialorder %v628_v0, -2.5  ;;  %v486_v30 = vmov 16843009   ;;  %v487_v34 = vmov 50463234  }
  0x36   : > { %v135_v2 = vsel %vm133_vm0, 16.0, %v482_v1  ;;  %v137_v5 = vsel %vm134_vm1, 40.0, %v483_v4  ;;  %v140_v9 = vsel %vm133_vm0, 64.0, %v484_v8  ;;  %v488_v36 = vmov 117900805   ;;  %s131_s17 = scalar_lea.vmem [#allocation5], %s306_s22 }
  0x37   : > { %v136_v3 = vsel %vm134_vm1, 16.0, %v135_v2  ;;  %v141_v12 = vsel %vm134_vm1, 128.0, %v140_v9  ;;  %v489_v39 = vmov 336728078   ;;  %v490_v41 = vmov 925903654  }
  0x38   : > { %v143_v6 = vmul.f32 %v136_v3, %v628_v0  ;;  %v491_v43 = vmov 2491642982   ;;  %v492_v48 = vmov 67372035   ;;  %v493_v51 = vmov 117835270  }
  0x39   : > { %v494_v53 = vmov 185272841   ;;  %v495_v55 = vmov 319950863   ;;  %v496_v60 = vmov 522001177   ;;  %vm142_vm8 = vcmp.eq.f32.partialorder %v628_v0, %v628_v0 }
  0x3a   : > { %v144_v7 = vadd.f32 %v143_v6, %v137_v5  ;;  %v497_v63 = vmov 858795306   ;;  %v498_v2 = vmov 1414482501   ;;  %v499_v4 = vmov 2323741298  }
  0x3b   : > { %v500_v8 = vmov 50529027   ;;  %s230_s25 = sshll.u32 %s131_s17, 4  ;;  %s309_s26 = sshll.u32 %s541_s10, 7  ;;  %s775_s25 = int_to_ptr.vmem [resolvable:$true] %s230_s25 }
  0x3c   : > { %v145_v10 = vfloor.f32 %v144_v7  ;;  %s228_s29 = scalar_lea.hbm %s816_s1, %s309_s26  ;;  %s217_s30 = scalar_lea.sflag [#allocation4], %s618_s21 }
  0x3d   : > { %s415_s2 = scalar_lea.vmem %s775_s25, 128  ;;  %p837_p12 = scmp.ne.s32.totalorder %s821_s18, 0 }
  0x3e   : > { %v146_v11 = vmax.f32 %v145_v10, 0.0  ;;  %v501_v10 = vmov 84215044   ;;  %p416_p11 = scmp.ne.s32.totalorder %s775_s25, %s415_s2  ;;  %s509_s10 = smov [#allocation5]  }
  0x3f   : > { %s419_s3 = sshll.u32 %s509_s10, 4  ;;  %s420_s3 = int_to_ptr.vmem [resolvable:$false] %s419_s3 }
  0x40   : > { %v147_v13 = vmin.f32 %v146_v11, 63.0  ;;  %p417_p13 = pnand %p416_p11, %p837_p12  ;;  %s421_s4 = scalar_lea.vmem %s420_s3, 256 }
  0x41   : > { %p422_p3 = scmp.lt.s32.totalorder %s775_s25, %s420_s3  ;;  %p423_p5 = scmp.lt.s32.totalorder %s421_s4, %s415_s2 }
  0x42   : > { %v148_v14 = vadd.f32 %v147_v13, %v141_v12  ;;  %p418_p1 = pneg %p417_p13 }
  0x43   : > { %p424_p8 = por %p423_p5, %p422_p3 }
  0x44   : > { %v312_v15 = vtrunc.f32 %v148_v14  ;;  %v502_v14 = vmov 151521287  }
  0x45   : > { %p425_p10 = pnand %p424_p8, %p418_p1 }
  0x46   : > { %v643_v16 = vcvt.f32.s32 %v312_v15 }
  0x48   : > { %v150_v17 = vand.u32 4, %v643_v16  ;;  %v152_v18 = vand.u32 8, %v643_v16  ;;  %v154_v19 = vand.u32 16, %v643_v16  ;;  %v156_v20 = vand.u32 32, %v643_v16 }
  0x49   : > { %v158_v21 = vand.u32 64, %v643_v16  ;;  %v160_v24 = vand.u32 128, %v643_v16  ;;  %v208_v25 = vand.u32 3, %v643_v16 }
  0x4a   : > { %vm650_vm2 = vcmp.ne.s32.totalorder %v150_v17, 0  ;;  %vm654_vm3 = vcmp.ne.s32.totalorder %v152_v18, 0  ;;  %vm660_vm4 = vcmp.ne.s32.totalorder %v154_v19, 0  ;;  %vm664_vm5 = vcmp.ne.s32.totalorder %v156_v20, 0 }
  0x4b   : > { %v162_v29 = vsel %vm650_vm2, 16842752, %v485_v28  ;;  %v164_v31 = vsel %vm650_vm2, 33620225, %v486_v30  ;;  %vm672_vm6 = vcmp.ne.s32.totalorder %v158_v21, 0  ;;  %v165_v35 = vsel %vm650_vm2, 67371779, %v487_v34 }
  0x4c   : > { %v163_v33 = vsel %vm654_vm3, %v162_v29, 0  ;;  %v168_v37 = vsel %vm650_vm2, 202049800, %v488_v36  ;;  %v166_v38 = vsel %vm654_vm3, %v165_v35, %v164_v31  ;;  %v169_v40 = vsel %vm650_vm2, 555555351, %v489_v39 }
  0x4d   : > { %v171_v42 = vsel %vm650_vm2, 1515144766, %v490_v41  ;;  %v172_v44 = vsel %vm650_vm2, 4124622504, %v491_v43  ;;  %v167_v45 = vsel %vm660_vm4, %v166_v38, %v163_v33  ;;  %v170_v46 = vsel %vm654_vm3, %v169_v40, %v168_v37 }
  0x4e   : > { %v173_v47 = vsel %vm654_vm3, %v172_v44, %v171_v42  ;;  %v176_v49 = vsel %vm650_vm2, 84215044, %v492_v48  ;;  %v177_v52 = vsel %vm650_vm2, 151521287, %v493_v51  ;;  %v179_v54 = vsel %vm650_vm2, 252579084, %v494_v53 }
  0x4f   : > { %v174_v50 = vsel %vm660_vm4, %v173_v47, %v170_v46  ;;  %v180_v56 = vsel %vm650_vm2, 404100372, %v495_v55  ;;  %v178_v58 = vsel %vm654_vm3, %v177_v52, %v176_v49  ;;  %v183_v61 = vsel %vm650_vm2, 656745249, %v496_v60 }
  0x50   : > { %v175_v57 = vsel %vm664_vm5, %v174_v50, %v167_v45  ;;  %v181_v59 = vsel %vm654_vm3, %v180_v56, %v179_v54  ;;  %v184_v1 = vsel %vm650_vm2, 1094531382, %v497_v63  ;;  %v186_v3 = vsel %vm650_vm2, 1801805657, %v498_v2 }
  0x51   : > { %v182_v62 = vsel %vm660_vm4, %v181_v59, %v178_v58  ;;  %v187_v5 = vsel %vm650_vm2, 2980486291, %v499_v4  ;;  %v185_v6 = vsel %vm654_vm3, %v184_v1, %v183_v61  ;;  %v192_v9 = vsel %vm650_vm2, 67372035, %v500_v8 }
  0x52   : > { %v188_v7 = vsel %vm654_vm3, %v187_v5, %v186_v3  ;;  %v193_v11 = vsel %vm650_vm2, 117835270, %v501_v10  ;;  %v195_v15 = vsel %vm650_vm2, 185207305, %v502_v14  ;;  %v503_v17 = vmov 235736332  }
  0x53   : > { %v189_v12 = vsel %vm660_vm4, %v188_v7, %v185_v6  ;;  %v194_v13 = vsel %vm654_vm3, %v193_v11, %v192_v9  ;;  %v196_v18 = vsel %vm650_vm2, 303108111, %v503_v17  ;;  %v504_v21 = vmov 387323155  }
  0x54   : > { %v190_v19 = vsel %vm664_vm5, %v189_v12, %v182_v62  ;;  %v197_v20 = vsel %vm654_vm3, %v196_v18, %v195_v15  ;;  %v199_v28 = vsel %vm650_vm2, 505158425, %v504_v21  ;;  %v505_v29 = vmov 656679456  }
  0x55   : > { %v200_v30 = vsel %vm650_vm2, 841952297, %v505_v29  ;;  %v506_v33 = vmov 1077688373   ;;  %v198_v35 = vsel %vm660_vm4, %v197_v20, %v194_v13  ;;  %v507_v36 = vmov 1768119639  }
  0x56   : > { %v201_v31 = vsel %vm654_vm3, %v200_v30, %v199_v28  ;;  %v202_v34 = vsel %vm650_vm2, 1380796484, %v506_v33  ;;  %v203_v37 = vsel %vm650_vm2, 2273277808, %v507_v36  ;;  %vm161_vm7 = vcmp.ne.s32.totalorder %v160_v24, 0 }
  0x57   : > { %v191_v38 = vsel %vm672_vm6, %v190_v19, %v175_v57  ;;  %v204_v39 = vsel %vm654_vm3, %v203_v37, %v202_v34  ;;  %v209_v40 = vshll.u32 %v208_v25, 3  ;;  %v508_v43 = vmov 0.00048828125  }
  0x58   : > { %v205_v41 = vsel %vm660_vm4, %v204_v39, %v201_v31  ;;  %v138_v24 = vsel %vm133_vm0, 0.001953125, %v508_v43 }
  0x59   : > { %v206_v22 = vsel %vm664_vm5, %v205_v41, %v198_v35  ;;  %v139_v23 = vsel %vm134_vm1, 0.03125, %v138_v24 }
  0x5a   : > { %v207_v42 = vsel %vm161_vm7, %v206_v22, %v191_v38 }
  0x5b   : > { %v210_v32 = vshrl.u32 %v207_v42, %v209_v40 }
  0x5d   : > { %v211_v44 = vand.u32 255, %v210_v32 }
  0x5f   : > { %v212_v16 = vcvt.s32.f32 %v211_v44 }
  0x61   : > { %v213_v25 = vmul.f32 %v212_v16, %v139_v23 }
  0x63   : > { %v214_v26 = vsel %vm142_vm8, %v213_v25, 0.0 }
  0x64   : > { %215 = vst [vmem:[%s131_s17] sm:$0xff] %v214_v26 }
  0x65   : > { %428 = shalt.err (!%p425_p10)
}
  0x66   : > { %s429_s5 = scalar_lea.hbm %s228_s29, 128  ;;  %s433_s14 = scalar_lea.hbm %s816_s1, 256 }
  0x67   : > { %p430_p2 = scmp.ne.s32.totalorder %s228_s29, %s429_s5  ;;  %p434_p7 = scmp.lt.s32.totalorder %s228_s29, %s816_s1 }
  0x68   : > { %p435_p0 = scmp.lt.s32.totalorder %s433_s14, %s429_s5 }
  0x69   : > { %p431_p4 = pnand %p430_p2, %p837_p12 }
  0x6a   : > { %p436_p6 = por %p435_p0, %p434_p7 }
  0x6b   : > { %p432_p9 = pneg %p431_p4 }
  0x6d   : > { %p437_p11 = pnand %p436_p6, %p432_p9 }
  0x6f   : > { %440 = shalt.err (!%p437_p11)
}
  0x70   : > { %316 = dma.vmem_to_hbm [thread:$0]  (%p837_p12), %s775_s25, 128, %s228_s29, %s217_s30  }
  0x71 PF: > { %s242_s21 = sand.u32 1, %s467_s6   ;;  %p838_p13 = scmp.ne.s32.totalorder %s822_s19, 0 }
  0x72   : > { %p839_p1 = scmp.ge.s32.totalorder %s479_s9, 2  ;;  %s243_s22 = scalar_lea.sflag [#allocation4], %s242_s21 }
  0x74   : > { %p323_p3 = pnand %p839_p1, %p838_p13 }
  0x76   : > { %p324_p5 = pneg %p323_p3 }
  0x78   : > { %462 = dma.done.wait (%p324_p5), %s243_s22, 128  }
  0x79   : > { %464 = vsyncadd (%p324_p5), %s243_s22, 4294967168  ;;  %p14_p8 = scmp.ge.s32.totalorder %s545_s12, 4   ;;  %s840_s6 = smov %s471_s7 }
  0x7a   : > { %s841_s7 = smov %s475_s8  ;;  %s842_s8 = smov %s557_s15 }
  0x7b   : > { %s843_s9 = smov %s545_s12  ;;  %16 = sbr.rel (!%p14_p8) target bundleno = 5 (0x5), region = 69 }
  0x80   :  { %248 = vsyncpa [#allocation3], 1 }
  0x81   :  { %250 = vsyncpa [#allocation3 + $0x1], 1 }
  0x82   :  { %251 = vsyncpa [#allocation4], 1 }
  0x83   :  { %253 = vsyncpa [#allocation4 + $0x1], 1 }

</bundles_post_ra>
